<compile_context>
chip_gen: v7x
topology: tpu7x:2x2x1
jax: 0.10.0
libtpu: 0.0.40
codegen_flags: <defaults>
</compile_context>

<pallas_src>
import jax
import jax.numpy as jnp
from jax.experimental import pallas as pl
from jax.experimental.pallas import tpu as pltpu


def _tpu_vmem_bytes():
    """Best-effort VMEM capacity query; conservative fallback if unavailable."""
    try:
        return int(pltpu.get_tpu_info().vmem_capacity_bytes)
    except Exception:
        return 64 << 20  # assume v7x-like per-TC VMEM if query fails


_VMEM_BYTES = _tpu_vmem_bytes()
if _VMEM_BYTES >= (100 << 20):
    # v5e / v6e: 128 MiB VMEM -> big tiles to amortize ~0.35 us/step overhead.
    TB_MAX = 16384
    _VMEM_LIMIT = 64 << 20
else:
    # v7x: 64 MiB physical VMEM per TC -> cap tiles to stay well clear of OOM.
    TB_MAX = 8192
    _VMEM_LIMIT = 32 << 20

# Below this flattened batch size a single block is used (launch-bound regime;
# splitting only adds per-step overhead). Above it we target >= 4 grid steps.
_SINGLE_BLOCK_MAX = 1024


def _qnet_kernel(x_ref, w_ref, b_ref, o_ref):
    # x_ref : (TB, E)  VMEM input tile (batch-tiled, double-buffered by BlockSpec)
    # w_ref : (E, S)   VMEM pre-transposed weight (grid-invariant)
    # b_ref : (1, S)   VMEM bias row (grid-invariant)
    # o_ref : (TB, S)  VMEM output tile written at true width (no lane padding in HBM)
    acc = jnp.dot(
        x_ref[...],
        w_ref[...],
        preferred_element_type=jnp.float32,
        precision=jax.lax.Precision.HIGHEST,
    )
    o_ref[...] = (acc + b_ref[...]).astype(o_ref.dtype)


def prepare_qnet_params(weight, bias):
    """One-time (model-init) parameter prep.

    weight: (S, E) in PyTorch nn.Linear layout; bias: (S,).
    Returns pre-transposed weight (E, S) and bias as a (1, S) row.
    """
    return jnp.transpose(weight), bias.reshape(1, -1)


@jax.jit
def qnet_forward(inputs, w_t, b_row):
    """inputs: (..., E); w_t: (E, S); b_row: (1, S). Returns (..., S) == inputs @ W^T + b."""
    lead_shape = inputs.shape[:-1]
    E = inputs.shape[-1]
    S = w_t.shape[-1]
    x2 = inputs.reshape(-1, E)
    B = x2.shape[0]

    if B <= _SINGLE_BLOCK_MAX:
        # Single block covering the whole (8-rounded) batch.
        tb = max(8, 8 * pl.cdiv(B, 8))
    else:
        # At least 4 grid steps so the "parallel" axis shards across both
        # TensorCores on v7x; capped by per-chip VMEM-derived TB_MAX.
        tb = min(TB_MAX, 8 * pl.cdiv(pl.cdiv(B, 4), 8))

    # Last block clips: out-of-range input rows read unspecified values, but each
    # output row depends only on its own input row and out-of-bounds output rows
    # are never written, so no wrapper-side padding copy is needed.
    grid = (pl.cdiv(B, tb),)

    out = pl.pallas_call(
        _qnet_kernel,
        out_shape=jax.ShapeDtypeStruct((B, S), inputs.dtype),
        grid_spec=pl.GridSpec(
            grid=grid,
            in_specs=[
                pl.BlockSpec((tb, E), lambda i: (i, 0)),   # batch-tiled input
                pl.BlockSpec((E, S), lambda i: (0, 0)),    # grid-invariant weight
                pl.BlockSpec((1, S), lambda i: (0, 0)),    # grid-invariant bias
            ],
            out_specs=pl.BlockSpec((tb, S), lambda i: (i, 0)),
        ),
        compiler_params=pltpu.CompilerParams(
            dimension_semantics=("parallel",),
            vmem_limit_bytes=_VMEM_LIMIT,
        ),
        cost_estimate=pl.CostEstimate(
            flops=2 * B * E * S,
            bytes_accessed=(B * E + B * S + E * S + S) * 4,
            transcendentals=0,
        ),
    )(x2, w_t, b_row)

    return out.reshape(*lead_shape, S)


if __name__ == "__main__":
    # Small shapes consistent with the module: entity_embed_dim=32, skill_dim=8,
    # inputs of shape (batch=2, n_agents=8, entity_embed_dim).
    entity_embed_dim = 32
    skill_dim = 8
    batch, n_agents = 2, 8

    key = jax.random.PRNGKey(0)
    k_x, k_w, k_b = jax.random.split(key, 3)

    # Deterministic init mimicking PyTorch Linear's uniform(-1/sqrt(E), 1/sqrt(E)).
    bound = entity_embed_dim ** -0.5
    weight = jax.random.uniform(
        k_w, (skill_dim, entity_embed_dim), dtype=jnp.float32,
        minval=-bound, maxval=bound)
    bias = jax.random.uniform(
        k_b, (skill_dim,), dtype=jnp.float32, minval=-bound, maxval=bound)
    inputs = jax.random.normal(
        k_x, (batch, n_agents, entity_embed_dim), dtype=jnp.float32)

    # One-time parameter prep (hoisted transpose).
    w_t, b_row = prepare_qnet_params(weight, bias)

    q = qnet_forward(inputs, w_t, b_row)
    q = jax.block_until_ready(q)

    # Pure-JAX reference check.
    q_ref = inputs @ weight.T + bias
    assert q.shape == (batch, n_agents, skill_dim)
    assert jnp.allclose(q, q_ref, atol=1e-5, rtol=1e-5)

    print("KERNEL_OK")
</pallas_src>

<mosaic_0001>
module attributes {stable_mosaic.version = 11 : i64} {
  func.func @_qnet_kernel(%arg0: i32, %arg1: memref<16x32xf32, #tpu.memory_space<vmem>>, %arg2: memref<32x8xf32, #tpu.memory_space<vmem>>, %arg3: memref<1x8xf32, #tpu.memory_space<vmem>>, %arg4: memref<16x8xf32, #tpu.memory_space<vmem>>) attributes {dimension_semantics = [#tpu.dimension_semantics<parallel>], iteration_bounds = array<i64: 1>, scalar_prefetch = 0 : i64, scratch_operands = 0 : i64, tpu.core_type = #tpu.core_type<tc>, window_params = [{transform_indices = @transform_0, window_bounds = array<i64: 16, 32>}, {pipeline_mode = #tpu.pipeline_mode<synchronous>, transform_indices = @transform_1, window_bounds = array<i64: 32, 8>}, {pipeline_mode = #tpu.pipeline_mode<synchronous>, transform_indices = @transform_2, window_bounds = array<i64: 1, 8>}, {transform_indices = @transform_3, window_bounds = array<i64: 16, 8>}]} {
    %c0 = arith.constant 0 : index
    %c0_0 = arith.constant 0 : index
    %0 = vector.load %arg1[%c0, %c0_0] : memref<16x32xf32, #tpu.memory_space<vmem>>, vector<16x32xf32>
    %c0_1 = arith.constant 0 : index
    %c0_2 = arith.constant 0 : index
    %1 = vector.load %arg2[%c0_1, %c0_2] : memref<32x8xf32, #tpu.memory_space<vmem>>, vector<32x8xf32>
    %cst = arith.constant dense<0.000000e+00> : vector<16x8xf32>
    %2 = tpu.matmul %0, %1, %cst {dimension_numbers = #tpu.dot_dimension_numbers<[1], [0], [0], [1], [0, 0, 1, 1], [], []>, precision = #tpu.contract_precision<fp32>} : vector<16x32xf32>, vector<32x8xf32>, vector<16x8xf32> -> vector<16x8xf32>
    %c0_3 = arith.constant 0 : index
    %c0_4 = arith.constant 0 : index
    %3 = vector.load %arg3[%c0_3, %c0_4] : memref<1x8xf32, #tpu.memory_space<vmem>>, vector<1x8xf32>
    %4 = vector.broadcast %3 : vector<1x8xf32> to vector<16x8xf32>
    %5 = arith.addf %2, %4 : vector<16x8xf32>
    %c0_5 = arith.constant 0 : index
    %c0_6 = arith.constant 0 : index
    %6 = vector.load %arg4[%c0_5, %c0_6] : memref<16x8xf32, #tpu.memory_space<vmem>>, vector<16x8xf32>
    tpu.vector_store %arg4[%c0_5, %c0_6], %5 {strides = array<i32>} : memref<16x8xf32, #tpu.memory_space<vmem>>, vector<16x8xf32>,
    return
  }
  func.func @transform_0(%arg0: i32) -> (i32, i32) {
    %c0_i32 = arith.constant 0 : i32
    %c0_i32_0 = arith.constant 0 : i32
    return %arg0, %c0_i32 : i32, i32
  }
  func.func @transform_1(%arg0: i32) -> (i32, i32) {
    %c0_i32 = arith.constant 0 : i32
    %c0_i32_0 = arith.constant 0 : i32
    %c0_i32_1 = arith.constant 0 : i32
    return %c0_i32, %c0_i32_0 : i32, i32
  }
  func.func @transform_2(%arg0: i32) -> (i32, i32) {
    %c0_i32 = arith.constant 0 : i32
    %c0_i32_0 = arith.constant 0 : i32
    %c0_i32_1 = arith.constant 0 : i32
    return %c0_i32, %c0_i32_0 : i32, i32
  }
  func.func @transform_3(%arg0: i32) -> (i32, i32) {
    %c0_i32 = arith.constant 0 : i32
    %c0_i32_0 = arith.constant 0 : i32
    return %arg0, %c0_i32 : i32, i32
  }
}

</mosaic_0001>

<bundles_post_ra>
// kernel: qnet_forward.1
= control target key start
LH: loop header
LB: loop body
LE: loop exit
PB: predicated region body
PF: predicated region fallthrough
CT: control target
= control target key end

     0   :  { %vm28_vm0 = vcmask 261120   ;;  %s840_s0 = inlined_call_operand.vmem [shape: f32[16,32], index: 0, kind: input, shape index: {}]   ;;  %s841_s1 = inlined_call_operand.vmem [shape: f32[32,8], index: 1, kind: input, shape index: {}]   ;;  %s842_s2 = inlined_call_operand.vmem [shape: f32[1,8], index: 2, kind: input, shape index: {}]   ;;  %s843_s3 = inlined_call_operand.hbm [shape: f32[16,8], index: 3, kind: output, shape index: {}]  }
   0x1   :  { %v17_v0 = vld [vmem:[%s841_s1] sm:$0xff]  ;;  %v18_v1 = vld [vmem:[%s841_s1 + $0x8] sm:$0xff]  ;;  %v19_v2 = vld [vmem:[%s841_s1 + $0x10] sm:$0xff] }
   0x2   :  { %v36_v3 = vand.u32 4294901760, %v17_v0  ;;  %v39_v4 = vand.u32 4294901760, %v18_v1  ;;  %v20_v5 = vld [vmem:[%s841_s1 + $0x18] sm:$0xff]  ;;  %v42_v6 = vand.u32 4294901760, %v19_v2  ;;  %v15_v7 = vld [vmem:[%s840_s0] sm:$0xff]  ;;  %v16_v8 = vld [vmem:[%s840_s0 + $0x8] sm:$0xff] }
   0x3   :  { %v45_v9 = vand.u32 4294901760, %v20_v5  ;;  %v30_v10 = vsel %vm28_vm0, %v15_v7, 0  ;;  %v33_v11 = vsel %vm28_vm0, %v16_v8, 0 }
   0x4   :  { %v685_v12 = vpack.c.bf16 %v39_v4, %v36_v3  ;;  %v813_v13 = vand.u32 4294901760, %v30_v10  ;;  %v815_v14 = vand.u32 4294901760, %v33_v11  ;;  %v126_v15 = vsub.f32 %v17_v0, %v36_v3 }
   0x5   :  { %8 = vsyncpa [#allocation3], 0  ;;  %v689_v16 = vpack.c.bf16 %v45_v9, %v42_v6  ;;  %v133_v17 = vsub.f32 %v18_v1, %v39_v4  ;;  %v140_v18 = vsub.f32 %v19_v2, %v42_v6  ;;  %v147_v19 = vsub.f32 %v20_v5, %v45_v9  ;;  %v582_v46 = vld [vmem:[%s842_s2] ss:$0 sm:$0xff]  ;;  %s772_s24 = smov [#allocation2]  }
   0x6   :  { %686 = vmatprep.subr.bf16.mxu1 %v685_v12  ;;  %710 = vmatprep.subr.bf16.mxu0 %v685_v12  ;;  %v105_v20 = vsub.f32 %v30_v10, %v813_v13  ;;  %v115_v21 = vsub.f32 %v33_v11, %v815_v14  ;;  %v127_v22 = vand.u32 4294901760, %v126_v15  ;;  %s571_s25 = sshll.u32 %s772_s24, 4  ;;  %vm563_vm1 = vcmask 64512   ;;  %s572_s25 = int_to_ptr.vmem [resolvable:$true] %s571_s25 }
   0x7   :  { %688 = vmatpush3.bf16.msra.mxu1 %v685_v12  ;;  %712 = vmatpush3.bf16.msra.mxu0 %v685_v12  ;;  %v134_v23 = vand.u32 4294901760, %v133_v17  ;;  %v141_v24 = vand.u32 4294901760, %v140_v18  ;;  %v148_v25 = vand.u32 4294901760, %v147_v19  ;;  %v701_v44 = vpack.c.bf16 %v133_v17, %v126_v15  ;;  %s748_s26 = scalar_lea.vmem %s572_s25, 256  ;;  %p753_p1 = scmp.lt.s32.totalorder %s572_s25, %s572_s25 }
   0x8   :  { %690 = vmatprep.subr.bf16.mxu1 %v689_v16  ;;  %714 = vmatprep.subr.bf16.mxu0 %v689_v16  ;;  %v106_v26 = vand.u32 4294901760, %v105_v20  ;;  %v116_v27 = vand.u32 4294901760, %v115_v21  ;;  %v128_v28 = vsub.f32 %v126_v15, %v127_v22  ;;  %v705_v45 = vpack.c.bf16 %v147_v19, %v140_v18  ;;  %p749_p0 = scmp.ne.s32.totalorder %s572_s25, %s748_s26  ;;  %p754_p2 = scmp.lt.s32.totalorder %s748_s26, %s748_s26 }
   0x9   :  { %v135_v29 = vsub.f32 %v133_v17, %v134_v23  ;;  %v717_v30 = vpack.c.bf16 %v134_v23, %v127_v22  ;;  %v142_v31 = vsub.f32 %v140_v18, %v141_v24  ;;  %v149_v32 = vsub.f32 %v147_v19, %v148_v25 }
   0xa   :  { %v107_v33 = vsub.f32 %v105_v20, %v106_v26  ;;  %660 = vmatprep.mubr.f32.mxu0 %v106_v26  ;;  %v117_v34 = vsub.f32 %v115_v21, %v116_v27  ;;  %v129_v35 = vand.u32 4294901760, %v128_v28  ;;  %v721_v43 = vpack.c.bf16 %v148_v25, %v141_v24  ;;  %p755_p3 = por %p754_p2, %p753_p1 }
   0xb   :  { %692 = vmatpush3.bf16.msra.mxu1 %v689_v16  ;;  %716 = vmatpush3.bf16.msra.mxu0 %v689_v16  ;;  %v136_v36 = vand.u32 4294901760, %v135_v29  ;;  %v143_v37 = vand.u32 4294901760, %v142_v31  ;;  %v150_v38 = vand.u32 4294901760, %v149_v32 }
   0xc   :  { %v108_v39 = vand.u32 4294901760, %v107_v33  ;;  %v118_v40 = vand.u32 4294901760, %v117_v34  ;;  %718 = vmatprep.subr.bf16.mxu0 %v717_v30  ;;  %p756_p4 = pnand %p755_p3, %p749_p0 }
   0xd   :  { %v693_v41 = vpack.c.bf16 %v136_v36, %v129_v35  ;;  %v697_v42 = vpack.c.bf16 %v150_v38, %v143_v37 }
   0xe   :  { %627 = vmatprep.mubr.f32.mxu1 %v108_v39  ;;  %661 = vmatmul.mubr.f32.vlgmr.msra.gmra.mrb[0].mxu0 %v116_v27 }
   0xf   :  { %628 = vmatmul.mubr.f32.vlgmr.msra.gmra.mrb[0].mxu1 %v118_v40  ;;  %694 = vmatprep.subr.bf16.mxu1 %v693_v41 }
  0x10   :  { %696 = vmatpush3.bf16.msra.mxu1 %v693_v41  ;;  %720 = vmatpush3.bf16.msra.mxu0 %v717_v30 }
  0x11   :  { %698 = vmatprep.subr.bf16.mxu1 %v697_v42  ;;  %722 = vmatprep.subr.bf16.mxu0 %v721_v43 }
  0x12   :  { %638 = vmatprep.mubr.f32.mxu1 %v813_v13  ;;  %671 = vmatprep.mubr.f32.mxu0 %v813_v13 }
  0x14   :  { %700 = vmatpush3.bf16.msra.mxu1 %v697_v42  ;;  %724 = vmatpush3.bf16.msra.mxu0 %v721_v43 }
  0x15   :  { %702 = vmatprep.subr.bf16.mxu1 %v701_v44  ;;  %726 = vmatprep.subr.bf16.mxu0 %v685_v12 }
  0x17   :  { %639 = vmatmul.mubr.f32.vlgmr.msra.gmra.mrb[0].mxu1 %v815_v14  ;;  %672 = vmatmul.mubr.f32.vlgmr.msra.gmra.mrb[0].mxu0 %v815_v14 }
  0x18   :  { %704 = vmatpush3.bf16.msra.mxu1 %v701_v44  ;;  %728 = vmatpush3.bf16.msra.mxu0 %v685_v12 }
  0x19   :  { %706 = vmatprep.subr.bf16.mxu1 %v705_v45  ;;  %730 = vmatprep.subr.bf16.mxu0 %v689_v16 }
  0x1a   :  { %649 = vmatprep.mubr.f32.mxu1 %v105_v20  ;;  %682 = vmatprep.mubr.f32.mxu0 %v813_v13 }
  0x1c   :  { %708 = vmatpush3.bf16.msra.mxu1 %v705_v45  ;;  %732 = vmatpush3.bf16.msra.mxu0 %v689_v16 }
  0x1f   :  { %650 = vmatmul.mubr.f32.vlgmr.msra.gmra.mrb[0].mxu1 %v115_v21  ;;  %683 = vmatmul.mubr.f32.vlgmr.msra.gmra.mrb[0].mxu0 %v815_v14 }
  0xf2   :  { %v651_v47 = vpop.f32.mrb[0].mxu1  ;;  %v684_v48 = vpop.f32.mrb[0].mxu0 }
  0xf3   :  { %v733_v49 = vadd.f32 %v651_v47, %v582_v46  ;;  %v297_v50 = vpop.f32.mrb[1].mxu1  ;;  %v553_v51 = vpop.f32.mrb[1].mxu0 }
  0xf4   :  { %v735_v52 = vadd.f32 %v582_v46, %v297_v50 }
  0xf5   :  { %v734_v53 = vadd.f32 %v733_v49, %v684_v48 }
  0xf6   :  { %v736_v54 = vadd.f32 %v735_v52, %v553_v51 }
  0xf7   :  { %565 = vst.msk [vmem:[#allocation2 + $0x8] sm:$0xff] %vm563_vm1, %v734_v53 }
  0xf8   :  { %564 = vst.msk [vmem:[#allocation2] sm:$0xff] %vm563_vm1, %v736_v54 }
  0xf9   :  { %759 = shalt.err (!%p756_p4)
}
  0xfa   :  { %s760_s28 = scalar_lea.hbm %s843_s3, 256 }
  0xfb   :  { %p761_p5 = scmp.ne.s32.totalorder %s843_s3, %s760_s28  ;;  %p764_p6 = scmp.lt.u32.totalorder %s760_s28, %s843_s3 }
  0xfd   :  { %p766_p7 = pnand %p764_p6, %p761_p5 }
  0xff   :  { %769 = shalt.err (!%p766_p7)
}
 0x100   :  { %s773_s6 = smov 128   ;;  %s774_s7 = smov 8  }
 0x101   :  { %577 = dma.vmem_to_hbm [thread:$0]  %s572_s25, 256, %s843_s3, [#allocation3], %s773_s6, %s773_s6, %s774_s7  }
 0x102   :  { %770 = dma.done.wait [#allocation3], 256  }
 0x103   :  { %771 = vsyncadd [#allocation3], 4294967040 }
 0x104   :  { %581 = vsyncpa [#allocation3], 1 }

</bundles_post_ra>
